<compile_context>
chip_gen: v7x
topology: tpu7x:2x2x1
jax: 0.10.0
libtpu: 0.0.40
codegen_flags: <defaults>
</compile_context>

<pallas_src>
import functools

import jax
import jax.numpy as jnp
from jax.experimental import pallas as pl
from jax.experimental.pallas import tpu as pltpu


def _mlp_kernel(x_ref, w1_ref, b1_ref, w2_ref, b2_ref, out_ref):
    # In-kernel cast of x to the matmul operand dtype (no-op for f32).
    x = x_ref[...].astype(w1_ref.dtype)
    # fc1: [B, D] @ [D, H] with f32 accumulation; bias + ReLU epilogue in f32.
    h = jnp.dot(x, w1_ref[...], preferred_element_type=jnp.float32)
    h = jnp.maximum(h + b1_ref[...], 0.0)
    # fc2: [B, H] @ [H, C_pad] with f32 accumulation; slice the MXU-N padding
    # off in-kernel so only the true num_classes columns are stored to HBM.
    o = jnp.dot(h.astype(w2_ref.dtype), w2_ref[...],
                preferred_element_type=jnp.float32)
    c = out_ref.shape[-1]
    out_ref[...] = (o[:, :c] + b2_ref[...]).astype(out_ref.dtype)


def prepare_params(w1, b1, w2, b2, *, use_bf16=False):
    """One-time parameter preprocessing (call at model init, not per forward).

    Pads fc2's output columns up to a lane multiple (MXU N-dim) and casts the
    matmul operands; biases stay f32 (the epilogue is computed in f32, so bf16
    operands are fine on v5e/v6e/v7x alike).
    """
    c = w2.shape[1]
    c_pad = max(128, ((c + 127) // 128) * 128)
    if c_pad != c:
        w2 = jnp.pad(w2, ((0, 0), (0, c_pad - c)))
    dt = jnp.bfloat16 if use_bf16 else jnp.float32
    return (w1.astype(dt),
            b1.astype(jnp.float32).reshape(1, -1),
            w2.astype(dt),
            b2.astype(jnp.float32).reshape(1, -1))


@functools.partial(jax.jit, static_argnames=("block_b",))
def neural_net_forward(x, params, *, block_b=1024):
    """x: [B, D] f32; params from prepare_params(). Returns [B, num_classes] f32."""
    w1, b1, w2, b2 = params
    B, D = x.shape
    H = w1.shape[1]
    C = b2.shape[1]          # true num_classes
    C_pad = w2.shape[1]      # MXU-N padded width (>=128)

    if B <= block_b:
        # Latency path (small batch): single un-pipelined invocation, all
        # operands VMEM-resident, no grid/pipeline overhead.
        return pl.pallas_call(
            _mlp_kernel,
            out_shape=jax.ShapeDtypeStruct((B, C), jnp.float32),
            in_specs=[pl.BlockSpec(memory_space=pltpu.MemorySpace.VMEM)] * 5,
            out_specs=pl.BlockSpec(memory_space=pltpu.MemorySpace.VMEM),
        )(x, w1, b1, w2, b2)

    # Throughput path: tile only over B; weights/biases have constant
    # index_maps so they are DMA'd once and stay VMEM-resident.
    n_b = pl.cdiv(B, block_b)
    if n_b > 1 and n_b % 2 == 1:
        n_b += 1  # even tile count keeps v7x's two TensorCores balanced
    # Re-balance the tile size to the (even) tile count; minimizes zero-padding.
    block_b = min(block_b, ((pl.cdiv(B, n_b) + 7) // 8) * 8)
    n_b = pl.cdiv(B, block_b)
    B_pad = n_b * block_b
    xp = jnp.pad(x, ((0, B_pad - B), (0, 0))) if B_pad != B else x

    out = pl.pallas_call(
        _mlp_kernel,
        out_shape=jax.ShapeDtypeStruct((B_pad, C), jnp.float32),
        grid=(n_b,),
        in_specs=[
            pl.BlockSpec((block_b, D), lambda i: (i, 0)),   # x tile
            pl.BlockSpec((D, H), lambda i: (0, 0)),         # w1 (resident)
            pl.BlockSpec((1, H), lambda i: (0, 0)),         # b1 (resident)
            pl.BlockSpec((H, C_pad), lambda i: (0, 0)),     # w2 (resident)
            pl.BlockSpec((1, C), lambda i: (0, 0)),         # b2 (resident)
        ],
        out_specs=pl.BlockSpec((block_b, C), lambda i: (i, 0)),
        compiler_params=pltpu.CompilerParams(
            dimension_semantics=("parallel",)),
    )(xp, w1, b1, w2, b2)
    return out[:B] if B_pad != B else out


def reference_forward(x, w1, b1, w2, b2):
    h = jnp.maximum(x @ w1 + b1, 0.0)
    return h @ w2 + b2


if __name__ == "__main__":
    # Shapes implied by the module: input_size -> 256 hidden -> num_classes.
    input_size = 64
    hidden = 256          # fixed by the module (nn.Linear(input_size, 256))
    num_classes = 16

    key = jax.random.PRNGKey(0)
    kx, kw1, kb1, kw2, kb2, kx2 = jax.random.split(key, 6)

    # PyTorch stores Linear weight as [out, in]; kernel keeps [in, out].
    w1 = jax.random.normal(kw1, (input_size, hidden), dtype=jnp.float32) * 0.05
    b1 = jax.random.normal(kb1, (hidden,), dtype=jnp.float32) * 0.05
    w2 = jax.random.normal(kw2, (hidden, num_classes), dtype=jnp.float32) * 0.05
    b2 = jax.random.normal(kb2, (num_classes,), dtype=jnp.float32) * 0.05

    params_f32 = prepare_params(w1, b1, w2, b2, use_bf16=False)
    params_bf16 = prepare_params(w1, b1, w2, b2, use_bf16=True)

    # --- small-batch latency path (f32, no grid) ---
    batch = 8
    x = jax.random.normal(kx, (batch, input_size), dtype=jnp.float32)
    out = jax.block_until_ready(neural_net_forward(x, params_f32))
    ref = reference_forward(x, w1, b1.reshape(1, -1), w2, b2.reshape(1, -1))
    assert out.shape == (batch, num_classes)
    assert jnp.allclose(out, ref, atol=1e-4, rtol=1e-4), "small-batch mismatch"

    # --- throughput path: tiled over B, odd tile count rebalanced to even ---
    big_batch = 2560
    xb = jax.random.normal(kx2, (big_batch, input_size), dtype=jnp.float32)
    out_b = jax.block_until_ready(
        neural_net_forward(xb, params_f32, block_b=1024))
    ref_b = reference_forward(xb, w1, b1.reshape(1, -1), w2, b2.reshape(1, -1))
    assert out_b.shape == (big_batch, num_classes)
    assert jnp.allclose(out_b, ref_b, atol=1e-4, rtol=1e-4), "batched mismatch"

    # --- bf16 matmul operands (in-kernel cast), f32 accumulation/epilogue ---
    out_bf = jax.block_until_ready(
        neural_net_forward(xb, params_bf16, block_b=1024))
    assert jnp.allclose(out_bf, ref_b, atol=1e-1, rtol=1e-1), "bf16 mismatch"

    print("KERNEL_OK")
</pallas_src>

<mosaic_0001>
module attributes {stable_mosaic.version = 11 : i64} {
  func.func @_mlp_kernel(%arg0: memref<8x64xf32, #tpu.memory_space<vmem>>, %arg1: memref<64x256xf32, #tpu.memory_space<vmem>>, %arg2: memref<1x256xf32, #tpu.memory_space<vmem>>, %arg3: memref<256x128xf32, #tpu.memory_space<vmem>>, %arg4: memref<1x16xf32, #tpu.memory_space<vmem>>, %arg5: memref<8x16xf32, #tpu.memory_space<vmem>>) attributes {dimension_semantics = [], scalar_prefetch = 0 : i64, scratch_operands = 0 : i64, tpu.core_type = #tpu.core_type<tc>} {
    %c0 = arith.constant 0 : index
    %c0_0 = arith.constant 0 : index
    %0 = vector.load %arg0[%c0, %c0_0] : memref<8x64xf32, #tpu.memory_space<vmem>>, vector<8x64xf32>
    %c0_1 = arith.constant 0 : index
    %c0_2 = arith.constant 0 : index
    %1 = vector.load %arg1[%c0_1, %c0_2] : memref<64x256xf32, #tpu.memory_space<vmem>>, vector<64x256xf32>
    %cst = arith.constant dense<0.000000e+00> : vector<8x256xf32>
    %2 = tpu.matmul %0, %1, %cst {dimension_numbers = #tpu.dot_dimension_numbers<[1], [0], [0], [1], [0, 0, 1, 1], [], []>} : vector<8x64xf32>, vector<64x256xf32>, vector<8x256xf32> -> vector<8x256xf32>
    %c0_3 = arith.constant 0 : index
    %c0_4 = arith.constant 0 : index
    %3 = vector.load %arg2[%c0_3, %c0_4] : memref<1x256xf32, #tpu.memory_space<vmem>>, vector<1x256xf32>
    %4 = vector.broadcast %3 : vector<1x256xf32> to vector<8x256xf32>
    %5 = arith.addf %2, %4 : vector<8x256xf32>
    %cst_5 = arith.constant 0.000000e+00 : f32
    %6 = vector.broadcast %cst_5 : f32 to vector<8x256xf32>
    %7 = arith.maximumf %5, %6 : vector<8x256xf32>
    %c0_6 = arith.constant 0 : index
    %c0_7 = arith.constant 0 : index
    %8 = vector.load %arg3[%c0_6, %c0_7] : memref<256x128xf32, #tpu.memory_space<vmem>>, vector<256x128xf32>
    %cst_8 = arith.constant dense<0.000000e+00> : vector<8x128xf32>
    %9 = tpu.matmul %7, %8, %cst_8 {dimension_numbers = #tpu.dot_dimension_numbers<[1], [0], [0], [1], [0, 0, 1, 1], [], []>} : vector<8x256xf32>, vector<256x128xf32>, vector<8x128xf32> -> vector<8x128xf32>
    %10 = vector.extract_strided_slice %9 {offsets = [0, 0], sizes = [8, 16], strides = [1, 1]} : vector<8x128xf32> to vector<8x16xf32>
    %c0_9 = arith.constant 0 : index
    %c0_10 = arith.constant 0 : index
    %11 = vector.load %arg4[%c0_9, %c0_10] : memref<1x16xf32, #tpu.memory_space<vmem>>, vector<1x16xf32>
    %12 = vector.broadcast %11 : vector<1x16xf32> to vector<8x16xf32>
    %13 = arith.addf %10, %12 : vector<8x16xf32>
    %c0_11 = arith.constant 0 : index
    %c0_12 = arith.constant 0 : index
    %14 = vector.load %arg5[%c0_11, %c0_12] : memref<8x16xf32, #tpu.memory_space<vmem>>, vector<8x16xf32>
    tpu.vector_store %arg5[%c0_11, %c0_12], %13 {strides = array<i32>} : memref<8x16xf32, #tpu.memory_space<vmem>>, vector<8x16xf32>,
    return
  }
}

</mosaic_0001>

<bundles_post_ra>
// kernel: neural_net_forward.1
= control target key start
LH: loop header
LB: loop body
LE: loop exit
PB: predicated region body
PF: predicated region fallthrough
CT: control target
= control target key end

     0   :  { %10 = vsyncpa [#allocation3], 0  ;;  %s575_s0 = inlined_call_operand.hbm [shape: f32[8,64], index: 0, kind: input, shape index: {}]   ;;  %s576_s1 = inlined_call_operand.hbm [shape: f32[64,256], index: 1, kind: input, shape index: {}]   ;;  %s577_s2 = inlined_call_operand.vmem [shape: f32[1,256], index: 2, kind: input, shape index: {}]   ;;  %s578_s3 = inlined_call_operand.hbm [shape: f32[256,128], index: 3, kind: input, shape index: {}]   ;;  %s579_s4 = inlined_call_operand.vmem [shape: f32[1,16], index: 4, kind: input, shape index: {}]   ;;  %s580_s5 = inlined_call_operand.hbm [shape: f32[8,16], index: 5, kind: output, shape index: {}]  }
   0x1   :  { %11 = vsyncpa [#allocation6], 0 }
   0x2   :  { %12 = vsyncpa [#allocation4], 0  ;;  %s482_s18 = smov [#allocation5]   ;;  %s388_s22 = scalar_lea.hbm %s576_s1, 2048 }
   0x3   :  { %s28_s19 = sshll.u32 %s482_s18, 4  ;;  %p389_p0 = scmp.ne.s32.totalorder %s576_s1, %s388_s22  ;;  %s29_s19 = int_to_ptr.vmem [resolvable:$true] %s28_s19 }
   0x4   :  { %p392_p1 = scmp.lt.u32.totalorder %s388_s22, %s576_s1 }
   0x6   :  { %p394_p2 = pnand %p392_p1, %p389_p0 }
   0x8   :  { %397 = shalt.err (!%p394_p2)
}
   0x9   :  { %s398_s27 = scalar_lea.vmem %s29_s19, 2048  ;;  %p403_p4 = scmp.lt.s32.totalorder %s29_s19, %s29_s19 }
   0xa   :  { %p399_p3 = scmp.ne.s32.totalorder %s29_s19, %s398_s27  ;;  %p404_p5 = scmp.lt.s32.totalorder %s398_s27, %s398_s27 }
   0xc   :  { %p405_p6 = por %p404_p5, %p403_p4 }
   0xe   :  { %p406_p7 = pnand %p405_p6, %p399_p3 }
  0x10   :  { %409 = shalt.err (!%p406_p7)
}
  0x11   :  { %s483_s28 = smov 256   ;;  %s484_s29 = smov 16  }
  0x12   :  { %34 = dma.hbm_to_vmem [thread:$0]  %s576_s1, 2048, %s29_s19, [#allocation6], %s483_s28, %s483_s28, %s484_s29  }
  0x13   :  { %s485_s7 = smov [#allocation2]   ;;  %s486_s9 = smov [#allocation7]  }
  0x14   :  { %s19_s8 = sshll.u32 %s485_s7, 4  ;;  %s42_s10 = sshll.u32 %s486_s9, 4  ;;  %s20_s8 = int_to_ptr.vmem [resolvable:$true] %s19_s8  ;;  %s43_s10 = int_to_ptr.vmem [resolvable:$true] %s42_s10 }
  0x15   :  { %s410_s13 = scalar_lea.hbm %s575_s0, 128 }
  0x16   :  { %p411_p8 = scmp.ne.s32.totalorder %s575_s0, %s410_s13  ;;  %p414_p9 = scmp.lt.u32.totalorder %s410_s13, %s575_s0 }
  0x18   :  { %p416_p10 = pnand %p414_p9, %p411_p8 }
  0x1a   :  { %419 = shalt.err (!%p416_p10)
}
  0x1b   :  { %s420_s1 = scalar_lea.vmem %s20_s8, 128  ;;  %p425_p12 = scmp.lt.s32.totalorder %s20_s8, %s20_s8 }
  0x1c   :  { %p421_p11 = scmp.ne.s32.totalorder %s20_s8, %s420_s1  ;;  %p426_p13 = scmp.lt.s32.totalorder %s420_s1, %s420_s1 }
  0x1e   :  { %p427_p0 = por %p426_p13, %p425_p12 }
  0x20   :  { %p428_p1 = pnand %p427_p0, %p421_p11 }
  0x22   :  { %431 = shalt.err (!%p428_p1)
}
  0x23   :  { %22 = dma.hbm_to_vmem [thread:$0]  %s575_s0, 128, %s20_s8, [#allocation3]  }
  0x24   :  { %s432_s22 = scalar_lea.hbm %s578_s3, 4096 }
  0x25   :  { %p433_p2 = scmp.ne.s32.totalorder %s578_s3, %s432_s22  ;;  %p436_p3 = scmp.lt.u32.totalorder %s432_s22, %s578_s3 }
  0x27   :  { %p438_p4 = pnand %p436_p3, %p433_p2 }
  0x29   :  { %441 = shalt.err (!%p438_p4)
}
  0x2a   :  { %s442_s27 = scalar_lea.vmem %s43_s10, 4096  ;;  %p447_p6 = scmp.lt.s32.totalorder %s43_s10, %s43_s10 }
  0x2b   :  { %p443_p5 = scmp.ne.s32.totalorder %s43_s10, %s442_s27  ;;  %p448_p7 = scmp.lt.s32.totalorder %s442_s27, %s442_s27 }
  0x2d   :  { %p449_p8 = por %p448_p7, %p447_p6 }
  0x2f   :  { %p450_p9 = pnand %p449_p8, %p443_p5 }
  0x31   :  { %453 = shalt.err (!%p450_p9)
}
  0x32   :  { %s487_s0 = smov 128   ;;  %s488_s28 = smov 8  }
  0x33   :  { %48 = dma.hbm_to_vmem [thread:$0]  %s578_s3, 4096, %s43_s10, [#allocation6], %s487_s0, %s487_s0, %s488_s28  }
  0x34   :  { %476 = dma.done.wait [#allocation3], 128  }
  0x35   :  { %477 = vsyncadd [#allocation3], 4294967168 }
  0x36   :  { %478 = dma.done.wait [#allocation6], 6144  }
  0x37   :  { %479 = vsyncadd [#allocation6], 4294961152  ;;  %v489_v0 = vmov 0.0   ;;  %v62_v1 = vld [vmem:[#allocation5 + $0x8] sm:$0xff]  ;;  %v64_v2 = vld [vmem:[#allocation5 + $0x18] sm:$0xff]  ;;  %vm89_vm0 = vcmask 523264  }
  0x38   :  { %157 = vmatprep.mubr.f32.mxu0 %v489_v0  ;;  %v61_v3 = vld [vmem:[#allocation5] sm:$0xff]  ;;  %v331_v4 = vpack.c.bf16 %v64_v2, %v62_v1  ;;  %v63_v5 = vld [vmem:[#allocation5 + $0x10] sm:$0xff]  ;;  %v66_v6 = vld [vmem:[#allocation5 + $0x28] sm:$0xff]  ;;  %s490_s9 = smov [#allocation8]   ;;  %vm276_vm1 = vcmask 130048  }
  0x39   :  { %v68_v7 = vld [vmem:[#allocation5 + $0x38] sm:$0xff]  ;;  %v333_v8 = vpack.c.bf16 %v63_v5, %v61_v3  ;;  %v65_v10 = vld [vmem:[#allocation5 + $0x20] sm:$0xff]  ;;  %v67_v11 = vld [vmem:[#allocation5 + $0x30] sm:$0xff]  ;;  %s284_s10 = sshll.u32 %s490_s9, 4  ;;  %s285_s10 = int_to_ptr.vmem [resolvable:$true] %s284_s10 }
  0x3a   :  { %v335_v9 = vpack.c.bf16 %v68_v7, %v66_v6  ;;  %v70_v12 = vld [vmem:[#allocation5 + $0x48] sm:$0xff]  ;;  %332 = vmatprep.subr.bf16.mxu0 %v331_v4  ;;  %v72_v13 = vld [vmem:[#allocation5 + $0x58] sm:$0xff]  ;;  %v337_v14 = vpack.c.bf16 %v67_v11, %v65_v10  ;;  %v69_v15 = vld [vmem:[#allocation5 + $0x40] sm:$0xff]  ;;  %v79_v10 = vlaneseq  ;;  %p459_p11 = scmp.lt.s32.totalorder %s285_s10, %s285_s10 }
  0x3b   :  { %334 = vmatpush1.bf16.msra.mxu0 %v333_v8  ;;  %v71_v16 = vld [vmem:[#allocation5 + $0x50] sm:$0xff]  ;;  %v339_v17 = vpack.c.bf16 %v72_v13, %v70_v12  ;;  %v74_v18 = vld [vmem:[#allocation5 + $0x68] sm:$0xff]  ;;  %v76_v19 = vld [vmem:[#allocation5 + $0x78] sm:$0xff] }
  0x3c   :  { %336 = vmatprep.subr.bf16.mxu0 %v335_v9  ;;  %v182_v20 = vld [vmem:[#allocation7 + $0x80] sm:$0xff]  ;;  %v183_v21 = vld [vmem:[#allocation7 + $0x88] sm:$0xff]  ;;  %v184_v26 = vld [vmem:[#allocation7 + $0x90] sm:$0xff]  ;;  %v341_v29 = vpack.c.bf16 %v71_v16, %v69_v15  ;;  %v343_v34 = vpack.c.bf16 %v76_v19, %v74_v18  ;;  %v80_v11 = vshrl.u32 %v79_v10, 7 }
  0x3d   :  { %v166_v22 = vld [vmem:[#allocation7] sm:$0xff]  ;;  %v167_v23 = vld [vmem:[#allocation7 + $0x8] sm:$0xff]  ;;  %v347_v24 = vpack.c.bf16 %v183_v21, %v182_v20  ;;  %v185_v27 = vld [vmem:[#allocation7 + $0x98] sm:$0xff] }
  0x3e   :  { %v349_v25 = vpack.c.bf16 %v167_v23, %v166_v22  ;;  %v168_v28 = vld [vmem:[#allocation7 + $0x10] sm:$0xff]  ;;  %v351_v30 = vpack.c.bf16 %v185_v27, %v184_v26  ;;  %v169_v31 = vld [vmem:[#allocation7 + $0x18] sm:$0xff]  ;;  %v186_v32 = vld [vmem:[#allocation7 + $0xa0] sm:$0xff]  ;;  %v81_v12 = vsub.s32 0, %v80_v11 }
  0x3f   :  { %338 = vmatpush1.bf16.msra.mxu0 %v337_v14  ;;  %v187_v33 = vld [vmem:[#allocation7 + $0xa8] sm:$0xff]  ;;  %v73_v35 = vld [vmem:[#allocation5 + $0x60] sm:$0xff]  ;;  %v75_v36 = vld [vmem:[#allocation5 + $0x70] sm:$0xff]  ;;  %348 = vmatprep.subr.bf16.mxu1 %v347_v24  ;;  %v353_v37 = vpack.c.bf16 %v169_v31, %v168_v28  ;;  %v85_v14 = vsub.s32 1, %v80_v11 }
  0x40   :  { %340 = vmatprep.subr.bf16.mxu0 %v339_v17  ;;  %350 = vmatpush3.bf16.msra.mxu1 %v349_v25  ;;  %v355_v38 = vpack.c.bf16 %v187_v33, %v186_v32  ;;  %v170_v39 = vld [vmem:[#allocation7 + $0x20] sm:$0xff]  ;;  %v171_v40 = vld [vmem:[#allocation7 + $0x28] sm:$0xff]  ;;  %v345_v41 = vpack.c.bf16 %v75_v36, %v73_v35  ;;  %v188_v42 = vld [vmem:[#allocation7 + $0xb0] sm:$0xff] }
  0x41   :  { %352 = vmatprep.subr.bf16.mxu1 %v351_v30  ;;  %v189_v43 = vld [vmem:[#allocation7 + $0xb8] sm:$0xff]  ;;  %v357_v44 = vpack.c.bf16 %v171_v40, %v170_v39  ;;  %v172_v46 = vld [vmem:[#allocation7 + $0x30] sm:$0xff]  ;;  %v190_v49 = vld [vmem:[#allocation7 + $0xc0] sm:$0xff] }
  0x42   :  { %v359_v45 = vpack.c.bf16 %v189_v43, %v188_v42  ;;  %v173_v47 = vld [vmem:[#allocation7 + $0x38] sm:$0xff]  ;;  %v191_v50 = vld [vmem:[#allocation7 + $0xc8] sm:$0xff]  ;;  %v174_v53 = vld [vmem:[#allocation7 + $0x40] sm:$0xff] }
  0x43   :  { %342 = vmatpush1.bf16.msra.mxu0 %v341_v29  ;;  %v60_v48 = vld [vmem:[#allocation2] sm:$0xff]  ;;  %v361_v51 = vpack.c.bf16 %v173_v47, %v172_v46  ;;  %v363_v52 = vpack.c.bf16 %v191_v50, %v190_v49  ;;  %v175_v54 = vld [vmem:[#allocation7 + $0x48] sm:$0xff]  ;;  %v192_v55 = vld [vmem:[#allocation7 + $0xd0] sm:$0xff] }
  0x44   :  { %344 = vmatprep.subr.bf16.mxu0 %v343_v34  ;;  %354 = vmatpush3.bf16.msra.mxu1 %v353_v37  ;;  %v193_v56 = vld [vmem:[#allocation7 + $0xd8] sm:$0xff]  ;;  %v365_v57 = vpack.c.bf16 %v175_v54, %v174_v53  ;;  %v176_v59 = vld [vmem:[#allocation7 + $0x50] sm:$0xff]  ;;  %v194_v61 = vld [vmem:[#allocation7 + $0xe0] sm:$0xff] }
  0x45   :  { %356 = vmatprep.subr.bf16.mxu1 %v355_v38  ;;  %v367_v58 = vpack.c.bf16 %v193_v56, %v192_v55  ;;  %v177_v60 = vld [vmem:[#allocation7 + $0x58] sm:$0xff]  ;;  %v195_v62 = vld [vmem:[#allocation7 + $0xe8] sm:$0xff]  ;;  %v178_v1 = vld [vmem:[#allocation7 + $0x60] sm:$0xff] }
  0x46   :  { %v369_v63 = vpack.c.bf16 %v177_v60, %v176_v59  ;;  %v371_v0 = vpack.c.bf16 %v195_v62, %v194_v61  ;;  %v179_v2 = vld [vmem:[#allocation7 + $0x68] sm:$0xff]  ;;  %v196_v4 = vld [vmem:[#allocation7 + $0xf0] sm:$0xff]  ;;  %v197_v5 = vld [vmem:[#allocation7 + $0xf8] sm:$0xff] }
  0x47   :  { %346 = vmatpush1.bf16.msra.mxu0 %v345_v41  ;;  %v373_v3 = vpack.c.bf16 %v179_v2, %v178_v1  ;;  %v375_v6 = vpack.c.bf16 %v197_v5, %v196_v4  ;;  %v180_v7 = vld [vmem:[#allocation7 + $0x70] sm:$0xff]  ;;  %v181_v8 = vld [vmem:[#allocation7 + $0x78] sm:$0xff] }
  0x48   :  { %358 = vmatpush3.bf16.msra.mxu1 %v357_v44  ;;  %v377_v9 = vpack.c.bf16 %v181_v8, %v180_v7  ;;  %v77_v13 = vld [vmem:[%s577_s2] sm:$0x3]  ;;  %s454_s2 = scalar_lea.vmem %s285_s10, 128 }
  0x49   :  { %360 = vmatprep.subr.bf16.mxu1 %v359_v45  ;;  %v82_v15 = vrot.slane %v77_v13, %v81_v12  ;;  %v86_v16 = vrot.slane %v77_v13, %v85_v14  ;;  %v295_v25 = vld [vmem:[%s579_s4] ss:$0 sm:$0xff]  ;;  %p455_p10 = scmp.ne.s32.totalorder %s285_s10, %s454_s2  ;;  %p460_p12 = scmp.lt.s32.totalorder %s454_s2, %s454_s2 }
  0x4a   :  { %294 = vmatmul.mubr.msk.f32.vlgmr.msra.gmra.mrb[0].mxu0 %vm89_vm0, %v60_v48 }
  0x4b   :  { %p461_p13 = por %p460_p12, %p459_p11 }
  0x4c   :  { %362 = vmatpush3.bf16.msra.mxu1 %v361_v51 }
  0x4d   :  { %364 = vmatprep.subr.bf16.mxu1 %v363_v52  ;;  %p462_p0 = pnand %p461_p13, %p455_p10 }
  0x50   :  { %366 = vmatpush3.bf16.msra.mxu1 %v365_v57 }
  0x51   :  { %368 = vmatprep.subr.bf16.mxu1 %v367_v58 }
  0x54   :  { %370 = vmatpush3.bf16.msra.mxu1 %v369_v63 }
  0x55   :  { %372 = vmatprep.subr.bf16.mxu1 %v371_v0 }
  0x58   :  { %374 = vmatpush3.bf16.msra.mxu1 %v373_v3 }
  0x59   :  { %376 = vmatprep.subr.bf16.mxu1 %v375_v6 }
  0x5c   :  { %378 = vmatpush3.bf16.msra.mxu1 %v377_v9 }
 0x11d   :  { %v159_v17 = vpop.f32.mrb[0].mxu0 }
 0x11e   :  { %v160_v18 = vadd.f32 %v159_v17, %v82_v15  ;;  %v161_v19 = vpop.f32.mrb[1].mxu0 }
 0x11f   :  { %v162_v20 = vadd.f32 %v161_v19, %v86_v16 }
 0x120   :  { %v164_v22 = vmax.f32 %v160_v18, 0.0 }
 0x121   :  { %v165_v21 = vmax.f32 %v162_v20, 0.0 }
 0x123   :  { %262 = vmatprep.mubr.f32.mxu1 %v165_v21 }
 0x124   :  { %263 = vmatmul.mubr.f32.vlgmr.msra.gmra.mrb[0].mxu1 %v164_v22 }
 0x1f7   :  { %v328_v23 = vpop.f32.mrb[0].mxu1 }
 0x1f8   :  { %v329_v24 = vpop.f32.mrb[1].mxu1 }
 0x1f9   :  { %v330_v26 = vadd.f32 %v329_v24, %v328_v23 }
 0x1fb   :  { %v275_v27 = vadd.f32 %v330_v26, %v295_v25 }
 0x1fd   :  { %277 = vst.msk [vmem:[#allocation8] sm:$0xff] %vm276_vm1, %v275_v27 }
 0x1fe   :  { %465 = shalt.err (!%p462_p0)
}
 0x1ff   :  { %s466_s13 = scalar_lea.hbm %s580_s5, 128 }
 0x200   :  { %p467_p1 = scmp.ne.s32.totalorder %s580_s5, %s466_s13  ;;  %p470_p2 = scmp.lt.u32.totalorder %s466_s13, %s580_s5 }
 0x202   :  { %p472_p3 = pnand %p470_p2, %p467_p1 }
 0x204   :  { %475 = shalt.err (!%p472_p3)
}
 0x205   :  { %287 = dma.vmem_to_hbm [thread:$0]  %s285_s10, 128, %s580_s5, [#allocation4]  }
 0x206   :  { %480 = dma.done.wait [#allocation4], 128  }
 0x207   :  { %481 = vsyncadd [#allocation4], 4294967168 }
 0x208   :  { %291 = vsyncpa [#allocation3], 1 }
 0x209   :  { %292 = vsyncpa [#allocation6], 1 }
 0x20a   :  { %293 = vsyncpa [#allocation4], 1 }

</bundles_post_ra>
